<compile_context>
chip_gen: v6e
topology: v6e:2x2x1
jax: 0.10.0
libtpu: 0.0.40
codegen_flags: <defaults>
</compile_context>

<pallas_src>
import functools

import jax
import jax.numpy as jnp
from jax import lax
from jax.experimental import pallas as pl
from jax.experimental.pallas import tpu as pltpu


def _head_kernel(x_ref, w_qkv_ref, o_ref, *, scale, head_size):
    # x_ref     : (1, N, C)  VMEM tile, one batch element
    # w_qkv_ref : (3H, C)    fused [Wq; Wk; Wv] in nn.Linear (out, in) layout
    # o_ref     : (1, N, H)
    x = x_ref[0]                     # (N, C) — native dtype, no up-cast
    w = w_qkv_ref[...]               # (3H, C)

    H = head_size

    # Fused projection: qkv[n, j] = sum_c x[n, c] * w[j, c]  -> (N, 3H) f32.
    qkv = lax.dot_general(
        x, w,
        dimension_numbers=(((1,), (1,)), ((), ())),
        preferred_element_type=jnp.float32,
    )
    # Fold the attention scale into q (N*H elements) rather than scaling the
    # (N, N) scores matrix — fewer VALU multiplies when N >> H.
    q = qkv[:, 0:H] * scale          # (N, H) f32
    k = qkv[:, H:2 * H]              # (N, H) f32
    v = qkv[:, 2 * H:3 * H]          # (N, H) f32

    # scores[n, m] = q[n] . k[m]  (contract last dims, no explicit transpose)
    scores = lax.dot_general(
        q, k,
        dimension_numbers=(((1,), (1,)), ((), ())),
        preferred_element_type=jnp.float32,
    )                                # (N, N) f32

    # Numerically-stable softmax along the last axis (f32 throughout).
    m = jnp.max(scores, axis=-1, keepdims=True)
    e = jnp.exp(scores - m)
    denom = jnp.sum(e, axis=-1, keepdims=True)
    weights = e * pl.reciprocal(denom, approx=True)   # EUP vrcp (free slot)

    # Context: (N, N) @ (N, H). Cast operands to the input dtype so bf16
    # inputs hit the MXU natively (no-op for f32).
    context = jnp.dot(
        weights.astype(x.dtype), v.astype(x.dtype),
        preferred_element_type=jnp.float32,
    )                                # (N, H)
    o_ref[0] = context.astype(o_ref.dtype)


@jax.jit
def head_forward(x, wq, wk, wv):
    """x: [B, N, C]; wq/wk/wv: [head_size, C] (PyTorch nn.Linear layout)."""
    B, N, C = x.shape
    H = wq.shape[0]
    scale = float(C) ** (-0.5)       # PyTorch module scales by dim**-0.5

    # Fuse the three projections into one weight, keeping the (out, in)
    # layout: no host-side transposes, a single weight DMA / VMEM residency.
    w_qkv = jnp.concatenate([wq, wk, wv], axis=0)     # (3H, C)

    kernel = functools.partial(_head_kernel, scale=scale, head_size=H)

    return pl.pallas_call(
        kernel,
        out_shape=jax.ShapeDtypeStruct((B, N, H), x.dtype),
        grid_spec=pltpu.PrefetchScalarGridSpec(
            num_scalar_prefetch=0,
            grid=(B,),
            in_specs=[
                # Block shapes equal the full array extents in the trailing
                # dims, so the (8, 128) divisibility rule is satisfied.
                pl.BlockSpec((1, N, C), lambda b: (b, 0, 0)),
                pl.BlockSpec((3 * H, C), lambda b: (0, 0)),
            ],
            out_specs=pl.BlockSpec((1, N, H), lambda b: (b, 0, 0)),
        ),
        compiler_params=pltpu.CompilerParams(
            dimension_semantics=("parallel",),
        ),
    )(x, w_qkv)


def head_reference(x, wq, wk, wv):
    """Pure-JAX reference matching the PyTorch forward."""
    C = x.shape[-1]
    scale = float(C) ** (-0.5)
    q = jnp.einsum("bnc,hc->bnh", x, wq)
    k = jnp.einsum("bnc,hc->bnh", x, wk)
    v = jnp.einsum("bnc,hc->bnh", x, wv)
    scores = jnp.einsum("bnh,bmh->bnm", q, k) * scale
    weights = jax.nn.softmax(scores, axis=-1)
    return jnp.einsum("bnm,bmh->bnh", weights, v)


if __name__ == "__main__":
    B, N, C, H = 2, 8, 32, 16  # batch, seq, dim, head_size

    key = jax.random.PRNGKey(0)
    kx, kq, kk, kv = jax.random.split(key, 4)

    x = jax.random.normal(kx, (B, N, C), dtype=jnp.float32)
    # Deterministic synthetic weights, PyTorch nn.Linear shape: [head_size, dim]
    wq = jax.random.normal(kq, (H, C), dtype=jnp.float32) * 0.1
    wk = jax.random.normal(kk, (H, C), dtype=jnp.float32) * 0.1
    wv = jax.random.normal(kv, (H, C), dtype=jnp.float32) * 0.1

    out = head_forward(x, wq, wk, wv)
    out = jax.block_until_ready(out)

    ref = head_reference(x, wq, wk, wv)
    assert out.shape == (B, N, H), out.shape
    # approx=True reciprocal introduces a tiny uniform per-row relative error,
    # so use a slightly looser tolerance than exact-math f32.
    assert jnp.allclose(out, ref, atol=2e-3, rtol=2e-3), (
        float(jnp.max(jnp.abs(out - ref)))
    )
    print("KERNEL_OK")
</pallas_src>

<mosaic_0001>
module attributes {stable_mosaic.version = 11 : i64} {
  func.func @_head_kernel(%arg0: i32, %arg1: memref<1x8x32xf32, #tpu.memory_space<vmem>>, %arg2: memref<48x32xf32, #tpu.memory_space<vmem>>, %arg3: memref<1x8x16xf32, #tpu.memory_space<vmem>>) attributes {dimension_semantics = [#tpu.dimension_semantics<parallel>], iteration_bounds = array<i64: 2>, scalar_prefetch = 0 : i64, scratch_operands = 0 : i64, tpu.core_type = #tpu.core_type<tc>, window_params = [{transform_indices = @transform_0, window_bounds = array<i64: 1, 8, 32>}, {pipeline_mode = #tpu.pipeline_mode<synchronous>, transform_indices = @transform_1, window_bounds = array<i64: 48, 32>}, {transform_indices = @transform_2, window_bounds = array<i64: 1, 8, 16>}]} {
    %c0 = arith.constant 0 : index
    %c0_0 = arith.constant 0 : index
    %c0_1 = arith.constant 0 : index
    %0 = vector.load %arg1[%c0, %c0_0, %c0_1] : memref<1x8x32xf32, #tpu.memory_space<vmem>>, vector<1x8x32xf32>
    %1 = vector.shape_cast %0 : vector<1x8x32xf32> to vector<8x32xf32>
    %c0_2 = arith.constant 0 : index
    %c0_3 = arith.constant 0 : index
    %2 = vector.load %arg2[%c0_2, %c0_3] : memref<48x32xf32, #tpu.memory_space<vmem>>, vector<48x32xf32>
    %cst = arith.constant dense<0.000000e+00> : vector<8x48xf32>
    %3 = tpu.matmul %1, %2, %cst {dimension_numbers = #tpu.dot_dimension_numbers<[1], [1], [0], [0], [0, 0, 1, 0], [], []>} : vector<8x32xf32>, vector<48x32xf32>, vector<8x48xf32> -> vector<8x48xf32>
    %4 = vector.extract_strided_slice %3 {offsets = [0, 0], sizes = [8, 16], strides = [1, 1]} : vector<8x48xf32> to vector<8x16xf32>
    %cst_4 = arith.constant 0.176776692 : f32
    %5 = vector.broadcast %cst_4 : f32 to vector<8x16xf32>
    %6 = arith.mulf %4, %5 : vector<8x16xf32>
    %7 = vector.extract_strided_slice %3 {offsets = [0, 16], sizes = [8, 16], strides = [1, 1]} : vector<8x48xf32> to vector<8x16xf32>
    %8 = vector.extract_strided_slice %3 {offsets = [0, 32], sizes = [8, 16], strides = [1, 1]} : vector<8x48xf32> to vector<8x16xf32>
    %cst_5 = arith.constant dense<0.000000e+00> : vector<8x8xf32>
    %9 = tpu.matmul %6, %7, %cst_5 {dimension_numbers = #tpu.dot_dimension_numbers<[1], [1], [0], [0], [0, 0, 1, 0], [], []>} : vector<8x16xf32>, vector<8x16xf32>, vector<8x8xf32> -> vector<8x8xf32>
    %cst_6 = arith.constant dense<0xFF800000> : vector<8xf32>
    %10 = vector.multi_reduction <maximumf>, %9, %cst_6 [1] : vector<8x8xf32> to vector<8xf32>
    %11 = vector.shape_cast %10 : vector<8xf32> to vector<8x1xf32>
    %12 = vector.broadcast %11 : vector<8x1xf32> to vector<8x8xf32>
    %13 = arith.subf %9, %12 : vector<8x8xf32>
    %14 = math.exp %13 : vector<8x8xf32>
    %cst_7 = arith.constant dense<0.000000e+00> : vector<8xf32>
    %15 = vector.multi_reduction <add>, %14, %cst_7 [1] : vector<8x8xf32> to vector<8xf32>
    %16 = vector.shape_cast %15 : vector<8xf32> to vector<8x1xf32>
    %17 = tpu.reciprocal %16 {approx = true} : vector<8x1xf32> -> vector<8x1xf32>
    %18 = vector.broadcast %17 : vector<8x1xf32> to vector<8x8xf32>
    %19 = arith.mulf %14, %18 : vector<8x8xf32>
    %cst_8 = arith.constant dense<0.000000e+00> : vector<8x16xf32>
    %20 = tpu.matmul %19, %8, %cst_8 {dimension_numbers = #tpu.dot_dimension_numbers<[1], [0], [0], [1], [0, 0, 1, 1], [], []>} : vector<8x8xf32>, vector<8x16xf32>, vector<8x16xf32> -> vector<8x16xf32>
    %c0_9 = arith.constant 0 : index
    %c0_10 = arith.constant 0 : index
    %c0_11 = arith.constant 0 : index
    %21 = vector.load %arg3[%c0_9, %c0_10, %c0_11] : memref<1x8x16xf32, #tpu.memory_space<vmem>>, vector<1x8x16xf32>
    %22 = vector.shape_cast %21 : vector<1x8x16xf32> to vector<8x16xf32>
    %23 = vector.shape_cast %20 : vector<8x16xf32> to vector<1x8x16xf32>
    tpu.vector_store %arg3[%c0_9, %c0_10, %c0_11], %23 {strides = array<i32>} : memref<1x8x16xf32, #tpu.memory_space<vmem>>, vector<1x8x16xf32>,
    return
  }
  func.func @transform_0(%arg0: i32) -> (i32, i32, i32) {
    %c0_i32 = arith.constant 0 : i32
    %c0_i32_0 = arith.constant 0 : i32
    %c0_i32_1 = arith.constant 0 : i32
    return %arg0, %c0_i32, %c0_i32_0 : i32, i32, i32
  }
  func.func @transform_1(%arg0: i32) -> (i32, i32) {
    %c0_i32 = arith.constant 0 : i32
    %c0_i32_0 = arith.constant 0 : i32
    %c0_i32_1 = arith.constant 0 : i32
    return %c0_i32, %c0_i32_0 : i32, i32
  }
  func.func @transform_2(%arg0: i32) -> (i32, i32, i32) {
    %c0_i32 = arith.constant 0 : i32
    %c0_i32_0 = arith.constant 0 : i32
    %c0_i32_1 = arith.constant 0 : i32
    return %arg0, %c0_i32, %c0_i32_0 : i32, i32, i32
  }
}

</mosaic_0001>

<bundles_post_ra>
// kernel: head_forward.1
= control target key start
LH: loop header
LB: loop body
LE: loop exit
PB: predicated region body
PF: predicated region fallthrough
CT: control target
= control target key end

     0   :  { %7 = vsyncpa [#allocation3], 0  ;;  %s798_s0 = inlined_call_operand.vmem [shape: f32[2,8,32], index: 0, kind: input, shape index: {}]   ;;  %s799_s1 = inlined_call_operand.vmem [shape: f32[48,32], index: 1, kind: input, shape index: {}]   ;;  %s800_s2 = inlined_call_operand.hbm [shape: f32[2,8,16], index: 2, kind: output, shape index: {}]  }
   0x1   :  { %9 = vsyncpa [#allocation3 + $0x1], 0  ;;  %s665_s9 = smov 0   ;;  %s667_s10 = smov 0  }
   0x2   :  { %s669_s11 = smov 0   ;;  %s671_s12 = smov 0  }
   0x3 LB: > { %s686_s13 = sadd.s32 4294967295, %s643_s12   ;;  %s480_s14 = sadd.s32 4294967294, %s643_s12   ;;  %s643_s12 = sphi %s671_s12, %s806_s12   ;;  %s639_s11 = sphi %s669_s11, %s805_s11   ;;  %s635_s10 = sphi %s667_s10, %s804_s10   ;;  %s631_s9 = sphi %s665_s9, %s803_s9  }
   0x4   : > { %s690_s15 = sadd.s32 1, %s643_s12   ;;  %s69_s16 = sadd.s32 1, %s639_s11 }
   0x5   : > { %s66_s17 = ssub.s32 %s643_s12, %s690_s15  ;;  %p79_p0 = scmp.ne.s32.totalorder %s639_s11, %s635_s10 }
   0x6   : > { %p67_p1 = scmp.eq.s32.totalorder %s66_s17, 0  ;;  %p80_p2 = scmp.eq.s32.totalorder %s686_s13, 1 }
   0x7   : > { %p85_p3 = scmp.ne.s32.totalorder %s635_s10, %s631_s9  ;;  %p86_p4 = scmp.eq.s32.totalorder %s480_s14, 1 }
   0x8   : > { %s701_s18 = scalar_select %p67_p1, %s639_s11, %s69_s16  }
   0x9   : > { %p703_p5 = por %p80_p2, %p79_p0  ;;  %p707_p6 = por %p86_p4, %p85_p3 }
   0xa   : > { %p483_p7 = scmp.ge.s32.totalorder %s643_s12, 1  ;;  %p114_p8 = scmp.lt.s32.totalorder %s643_s12, 3 }
   0xc   : > { %p115_p9 = pnand %p483_p7, %p114_p8 }
   0xd   : > { %p135_p10 = scmp.lt.s32.totalorder (!%p115_p9), %s686_s13, 1  ;;  %s647_s16 = smov (!%p115_p9), 112  }
   0xe   : > { %118 = sbr.rel (%p115_p9) target bundleno = 1067 (0x42b), region = 28  ;;  %s648_s17 = smov (!%p115_p9), 96  }
   0xf   : > { %s132_s21 = sand.u32 (!%p115_p9), 1, %s635_s10   ;;  %s497_s23 = sshll.u32 (!%p115_p9), %s686_s13, 7 }
  0x10   : > { %s484_s22 = sshll.u32 (!%p115_p9), %s132_s21, 3  ;;  %s756_s28 = scalar_lea.hbm (!%p115_p9), %s800_s2, %s497_s23 }
  0x11   : > { %s134_s24 = scalar_lea.vmem (!%p115_p9), [#allocation2], %s484_s22 }
  0x12   : > { %s421_s25 = sshll.u32 (!%p115_p9), %s134_s24, 4  ;;  %s758_s25 = int_to_ptr.vmem [resolvable:$true] %s421_s25 }
  0x13   : > { %v145_v0 = vld [vmem:[%s799_s1 + $0x28] sm:$0xff]  ;;  %vm146_vm0 = vcmask 261120   ;;  %v645_v1 = vmov 0.0   ;;  %vm646_vm1 = vmmov 0   ;;  %v144_v2 = vld [vmem:[%s799_s1 + $0x20] sm:$0xff]  ;;  %v143_v3 = vld [vmem:[%s799_s1 + $0x18] sm:$0xff] }
  0x14   : > { %511 = vmatprep.subr.mxu0 %v645_v1  ;;  %523 = vmatprep.mubr.msk.f32.mxu0 %vm646_vm1, %v645_v1  ;;  %v142_v4 = vld [vmem:[%s799_s1 + $0x10] sm:$0xff]  ;;  %s136_s29 = scalar_select %p135_p10, %s686_s13, 1  ;;  %v141_v5 = vld [vmem:[%s799_s1 + $0x8] sm:$0xff]  ;;  %v140_v6 = vld [vmem:[%s799_s1] sm:$0xff]  ;;  %vm242_vm2 = vcmask 130048   ;;  %vm318_vm3 = vcmask 64512  }
  0x15   : > { %512 = vmatpush3.xpose.msk.msra.mxu0 %vm146_vm0, %v145_v0  ;;  %526 = vmatprep.subr.mxu1 %v645_v1  ;;  %s583_s30 = scalar_lea.vmem %s758_s25, 128  ;;  %s649_s13 = smov [#allocation2]  }
  0x16   : > { %513 = vmatprep.subr.mxu0 %v645_v1  ;;  %528 = vmatprep.mubr.msk.f32.mxu1 %vm646_vm1, %v645_v1  ;;  %s485_s4 = sshll.u32 %s136_s29, 3  ;;  %s408_s29 = scalar_lea.sflag [#allocation3], %s132_s21 }
  0x17   : > { %s138_s14 = scalar_lea.vmem %s798_s0, %s485_s4  ;;  %p584_p11 = scmp.ne.s32.totalorder %s758_s25, %s583_s30 }
  0x18   : > { %v139_v7 = vld [vmem:[%s138_s14] sm:$0xff]  ;;  %s587_s3 = sshll.u32 %s649_s13, 4  ;;  %s588_s3 = int_to_ptr.vmem [resolvable:$false] %s587_s3 }
  0x19   : > { %514 = vmatpush3.xpose.msk.msra.mxu0 %vm146_vm0, %v144_v2  ;;  %p585_p12 = pnand %p584_p11, %p703_p5  ;;  %s589_s4 = scalar_lea.vmem %s588_s3, 256 }
  0x1a   : > { %515 = vmatprep.subr.mxu0 %v645_v1  ;;  %p590_p0 = scmp.lt.s32.totalorder %s758_s25, %s588_s3  ;;  %p591_p1 = scmp.lt.s32.totalorder %s589_s4, %s583_s30 }
  0x1b   : > { %p586_p13 = pneg %p585_p12 }
  0x1c   : > { %p592_p2 = por %p591_p1, %p590_p0 }
  0x1d   : > { %516 = vmatpush3.xpose.msk.msra.mxu0 %vm146_vm0, %v143_v3 }
  0x1e   : > { %517 = vmatprep.subr.mxu0 %v645_v1  ;;  %p593_p3 = pnand %p592_p2, %p586_p13 }
  0x21   : > { %518 = vmatpush3.xpose.msk.msra.mxu0 %vm146_vm0, %v142_v4 }
  0x22   : > { %519 = vmatprep.subr.mxu0 %v645_v1 }
  0x25   : > { %520 = vmatpush3.xpose.msk.msra.mxu0 %vm146_vm0, %v141_v5 }
  0x26   : > { %521 = vmatprep.subr.mxu0 %v645_v1 }
  0x29   : > { %522 = vmatpush3.xpose.msk.msra.mxu0 %vm146_vm0, %v140_v6 }
  0x2c   : > { %524 = vmatmul.mubr.msk.f32.vlgmr.msra.gmra.mxu0 %vm146_vm0, %v139_v7 }
  0xec   : > { %v234_v8 = vpop.f32.mrf.mxu0 }
  0xed   : > { %240 = vrot.lane.b32.xlu0 %v234_v8, %s647_s16  ;;  %v238_v11 = vmul.f32 0.17677669, %v234_v8 }
  0xee   : > { %v525_v9 = vpop.f32.mrf.mxu0 }
 0x15f   : > { %v241_v10 = vpop.permute.xlu0 %240 }
 0x160   : > { %527 = vmatpush3.xpose.msk.msra.mxu1 %vm242_vm2, %v241_v10 }
 0x161   : > { %531 = vmatprep.subr.mxu1 %v645_v1 }
 0x163   : > { %529 = vmatmul.mubr.msk.f32.vlgmr.msra.gmra.mxu1 %vm242_vm2, %v238_v11 }
 0x164   : > { %533 = vmatprep.mubr.msk.f32.mxu1 %vm646_vm1, %v645_v1 }
 0x223   : > { %v314_v12 = vpop.f32.mrf.mxu1 }
 0x224   : > { %v319_v13 = vsel %vm318_vm3, %v314_v12, -inf }
 0x225   : > { %320 = vmax.xlane.f32.xlu0 %v319_v13  ;;  %v530_v14 = vpop.f32.mrf.mxu1 }
 0x2ae   : > { %v321_v15 = vpop.xlane.xlu0 %320 }
 0x2af   : > { %v322_v16 = vsub.f32 %v314_v12, %v321_v15 }
 0x2b1   : > { %v323_v17 = vmul.f32 1.442695, %v322_v16 }
 0x2b3   : > { %579 = vpow2.f32 %v323_v17 }
 0x2c0   : > { %v580_v18 = vpop.eup %579 }
 0x2c1   : > { %v325_v19 = vsel %vm318_vm3, %v580_v18, 0.0 }
 0x2c2   : > { %326 = vadd.xlane.f32.xlu1 %v325_v19 }
 0x2d3   : > { %330 = vrot.lane.b32.xlu1 %v234_v8, %s648_s17 }
 0x34b   : > { %v327_v20 = vpop.xlane.xlu1 %326 }
 0x34c   : > { %581 = vrcp.f32 %v327_v20 }
 0x34f   : > { %v331_v21 = vpop.permute.xlu1 %330 }
 0x350   : > { %532 = vmatpush3.msra.mxu1 %v331_v21 }
 0x359   : > { %v582_v22 = vpop.eup %581 }
 0x35a   : > { %v329_v23 = vmul.f32 %v582_v22, %v580_v18 }
 0x35c   : > { %534 = vmatmul.mubr.msk.f32.vlgmr.msra.gmra.mxu1 %vm318_vm3, %v329_v23 }
 0x41c   : > { %v402_v24 = vpop.f32.mrf.mxu1 }
 0x41d   : > { %406 = vst.msk [vmem:[%s134_s24] sm:$0xff] %vm242_vm2, %v402_v24 }
 0x41e   : > { %v535_v25 = vpop.f32.mrf.mxu1 }
 0x41f   : > { %596 = shalt.err (!%p593_p3)
}
 0x420   : > { %s597_s5 = scalar_lea.hbm %s756_s28, 128  ;;  %s601_s8 = scalar_lea.hbm %s800_s2, 256 }
 0x421   : > { %p598_p4 = scmp.ne.s32.totalorder %s756_s28, %s597_s5  ;;  %p602_p9 = scmp.lt.s32.totalorder %s756_s28, %s800_s2 }
 0x422   : > { %p603_p10 = scmp.lt.s32.totalorder %s601_s8, %s597_s5 }
 0x423   : > { %p599_p7 = pnand %p598_p4, %p703_p5 }
 0x424   : > { %p604_p11 = por %p603_p10, %p602_p9 }
 0x425   : > { %p600_p8 = pneg %p599_p7 }
 0x427   : > { %p605_p12 = pnand %p604_p11, %p600_p8 }
 0x429   : > { %608 = shalt.err (!%p605_p12)
}
 0x42a   : > { %536 = dma.vmem_to_hbm [thread:$0]  (%p703_p5), %s758_s25, 128, %s756_s28, %s408_s29  }
 0x42b PF: > { %p542_p13 = scmp.ge.s32.totalorder %s643_s12, 2  ;;  %s433_s17 = sand.u32 1, %s631_s9  }
 0x42c   : > { %s434_s21 = scalar_lea.sflag [#allocation3], %s433_s17 }
 0x42d   : > { %p539_p0 = pnand %p542_p13, %p707_p6 }
 0x42f   : > { %p540_p1 = pneg %p539_p0 }
 0x431   : > { %626 = dma.done.wait (%p540_p1), %s434_s21, 128  }
 0x432   : > { %628 = vsyncadd (%p540_p1), %s434_s21, 4294967168  ;;  %p12_p2 = scmp.ge.s32.totalorder %s690_s15, 4   ;;  %s803_s9 = smov %s635_s10 }
 0x433   : > { %s804_s10 = smov %s639_s11  ;;  %s805_s11 = smov %s701_s18 }
 0x434   : > { %s806_s12 = smov %s690_s15  ;;  %14 = sbr.rel (!%p12_p2) target bundleno = 3 (0x3), region = 63 }
 0x439   :  { %439 = vsyncpa [#allocation3], 1 }
 0x43a   :  { %441 = vsyncpa [#allocation3 + $0x1], 1 }

</bundles_post_ra>
